<compile_context>
chip_gen: v7x
topology: tpu7x:2x2x1
jax: 0.10.0
libtpu: 0.0.40
codegen_flags: <defaults>
</compile_context>

<pallas_src>
from functools import partial

import jax
import jax.numpy as jnp
from jax.experimental import pallas as pl
from jax.experimental.pallas import tpu as pltpu


def _round_up(x, m):
    return (x + m - 1) // m * m


def _tensorcores_per_chip():
    """2 on v7x-class parts (two TCs/chip), else 1."""
    try:
        kind = jax.devices()[0].device_kind.lower()
    except Exception:
        return 1
    return 2 if "7" in kind else 1


def _qsoftattn_pool_kernel(x_ref, batch_ref, wf_ref, bf_ref, out_ref, acc_ref, *,
                           n_nodes, n_tiles, tiles_per_chunk):
    c = pl.program_id(0)
    k = pl.program_id(1)
    bi = c * tiles_per_chunk + k          # logical tile index along N

    @pl.when(k == 0)
    def _():
        acc_ref[...] = jnp.zeros_like(acc_ref)

    # Over-run tiles (last chunk when chunks*tiles_per_chunk > n_tiles) are skipped
    # entirely; their index_map is clamped so the DMA stays in bounds.
    @pl.when(bi < n_tiles)
    def _():
        tile_n = x_ref.shape[0]
        num_graphs = acc_ref.shape[0]

        x_cat = x_ref[...]                                         # [tile_n, 4D] lane-dense

        # fused QLinear + RealTransformer('linear'), lane-dense gate:
        #   att4 = sigmoid(x_cat @ W_fused4 + b_fused4)            # [tile_n, 4D]
        att4 = jax.nn.sigmoid(
            jnp.dot(x_cat, wf_ref[...], preferred_element_type=jnp.float32)
            + bf_ref[...])

        # gate the ORIGINAL input (all 4 quaternion components at once)
        gated = x_cat.astype(jnp.float32) * att4                   # [tile_n, 4D]

        # ragged-tail validity mask (x is NOT padded in HBM; garbage rows -> 0)
        node = bi * tile_n + jax.lax.broadcasted_iota(jnp.int32, (tile_n, 1), 0)
        gated = jnp.where(node < n_nodes, gated, 0.0)

        # one-hot segment block built in-kernel (no [B, N] matrix in HBM);
        # garbage batch ids in the tail are harmless (gated rows already zeroed).
        seg = (jax.lax.broadcasted_iota(jnp.int32, (num_graphs, tile_n), 0)
               == batch_ref[...]).astype(jnp.float32)              # [B, tile_n]

        # per-graph sum pooling as a single MXU matmul, accumulated across N tiles
        acc_ref[...] += jnp.dot(seg, gated, preferred_element_type=jnp.float32)

    @pl.when(k == pl.num_programs(1) - 1)
    def _():
        out_ref[...] = acc_ref[...].astype(out_ref.dtype)


def quaternion_soft_attention_pooling(x, batch, num_graphs, wq, bq, wrt, brt,
                                      *, tile_n=2048, parallel_chunks=None):
    """x: [N, 4, D] f32 (node-major, i.e. QTensor.stack(dim=1) layout),
    batch: [N] int graph ids.  Returns [4, num_graphs, D] f32 (r, i, j, k)."""
    n, four, d = x.shape
    assert four == 4
    d4 = 4 * d

    # ---- algebraic fusion of QLinear and RealTransformer (done once in XLA) ----
    wr, wi, wj, wk = wq[0], wq[1], wq[2], wq[3]
    w_ham = jnp.concatenate([
        jnp.concatenate([wr,   wi,  wj,  wk], axis=1),
        jnp.concatenate([-wi,  wr, -wk,  wj], axis=1),
        jnp.concatenate([-wj,  wk,  wr, -wi], axis=1),
        jnp.concatenate([-wk, -wj,  wi,  wr], axis=1),
    ], axis=0)                                                 # [4D, 4D] Hamilton matrix
    b_ham = jnp.concatenate([bq[0, 0], bq[1, 0], bq[2, 0], bq[3, 0]], axis=0)   # [4D]
    w_rt = wrt.reshape(d4, d)                                  # [4D, D]
    w_fused = w_ham @ w_rt                                     # [4D, D]
    b_fused = b_ham @ w_rt + brt[0]                            # [D]
    # column-replicate so the kernel's gate is lane-dense ([tile_n, 4D] directly)
    w_fused4 = jnp.concatenate([w_fused] * 4, axis=1).astype(x.dtype)           # [4D, 4D]
    b_fused4 = jnp.tile(b_fused.reshape(1, d), (1, 4)).astype(x.dtype)          # [1, 4D]

    # ---- lane-dense node layout: [N, 4D] is a FREE reshape of [N, 4, D] ----
    x_cat = x.reshape(n, d4)
    batch2d = batch.astype(jnp.int32).reshape(1, n)

    # ---- tiling over N (no HBM padding; tail handled in-kernel) ----
    tile_n = max(128, min(int(tile_n), _round_up(n, 128)))
    tile_n = _round_up(tile_n, 128)
    # keep the in-kernel [B, tile_n] one-hot block bounded (~8 MiB of intermediates)
    cap = max(128, ((8 << 20) // (max(1, num_graphs) * 8)) // 128 * 128)
    tile_n = min(tile_n, cap)

    n_tiles = pl.cdiv(n, tile_n)
    if parallel_chunks is None:
        parallel_chunks = _tensorcores_per_chip()
    chunks = max(1, min(int(parallel_chunks), n_tiles))
    tiles_per_chunk = pl.cdiv(n_tiles, chunks)

    def tile_idx(c, k):
        # clamp so the DMA never goes out of bounds; over-run tiles are skipped in-kernel
        return jnp.minimum(c * tiles_per_chunk + k, n_tiles - 1)

    kernel = partial(_qsoftattn_pool_kernel,
                     n_nodes=n, n_tiles=n_tiles, tiles_per_chunk=tiles_per_chunk)

    out = pl.pallas_call(
        kernel,
        out_shape=jax.ShapeDtypeStruct((chunks, num_graphs, d4), jnp.float32),
        grid=(chunks, tiles_per_chunk),
        in_specs=[
            pl.BlockSpec((tile_n, d4), lambda c, k: (tile_idx(c, k), 0)),   # x_cat
            pl.BlockSpec((1, tile_n), lambda c, k: (0, tile_idx(c, k))),    # batch ids
            pl.BlockSpec((d4, d4), lambda c, k: (0, 0)),                    # fused weight
            pl.BlockSpec((1, d4), lambda c, k: (0, 0)),                     # fused bias
        ],
        out_specs=pl.BlockSpec((None, num_graphs, d4), lambda c, k: (c, 0, 0)),
        scratch_shapes=[pltpu.VMEM((num_graphs, d4), jnp.float32)],
        compiler_params=pltpu.CompilerParams(
            dimension_semantics=("parallel", "arbitrary")),
    )(x_cat, batch2d, w_fused4, b_fused4)

    pooled = out[0] if chunks == 1 else jnp.sum(out, axis=0)           # [B, 4D]
    return jnp.transpose(pooled.reshape(num_graphs, 4, d), (1, 0, 2))  # [4, B, D]


def _reference(x4, batch, num_graphs, wq, bq, wrt, brt):
    """Pure-JAX reference mirroring the PyTorch forward (unfused). x4: [4, N, D]."""
    xr, xi, xj, xk = x4[0], x4[1], x4[2], x4[3]
    wr, wi, wj, wk = wq[0], wq[1], wq[2], wq[3]
    yr = xr @ wr - xi @ wi - xj @ wj - xk @ wk + bq[0]
    yi = xr @ wi + xi @ wr + xj @ wk - xk @ wj + bq[1]
    yj = xr @ wj - xi @ wk + xj @ wr + xk @ wi + bq[2]
    yk = xr @ wk + xi @ wj - xj @ wi + xk @ wr + bq[3]
    cat = jnp.concatenate([yr, yi, yj, yk], axis=-1)                  # [N, 4D]
    att = jax.nn.sigmoid(cat @ wrt.reshape(-1, wrt.shape[-1]) + brt[0])
    gated = jnp.stack([att * xr, att * xi, att * xj, att * xk], axis=0)
    seg = (batch[None, :] == jnp.arange(num_graphs)[:, None]).astype(x4.dtype)
    return jnp.einsum("bn,cnd->cbd", seg, gated)


if __name__ == "__main__":
    key = jax.random.PRNGKey(0)

    # ---------------- test 1: the module's toy configuration ----------------
    embed_dim = 32          # D
    n_nodes = 8             # N (total nodes across the batch of graphs)
    num_graphs = 2          # B

    kx, kwq, kbq, kwrt, kbrt, k2x, k2b = jax.random.split(key, 7)

    x4 = jax.random.normal(kx, (4, n_nodes, embed_dim), dtype=jnp.float32)  # [4, N, D]
    batch = jnp.array([0, 0, 0, 0, 1, 1, 1, 1], dtype=jnp.int32)

    scale = 1.0 / jnp.sqrt(jnp.float32(embed_dim))
    wq = jax.random.normal(kwq, (4, embed_dim, embed_dim), dtype=jnp.float32) * scale
    bq = jax.random.normal(kbq, (4, 1, embed_dim), dtype=jnp.float32) * 0.01
    wrt = jax.random.normal(kwrt, (4, embed_dim, embed_dim), dtype=jnp.float32) * (scale * 0.5)
    brt = jax.random.normal(kbrt, (1, embed_dim), dtype=jnp.float32) * 0.01

    # kernel takes node-major [N, 4, D] (== QTensor.stack(dim=1) layout)
    x_nm = jnp.transpose(x4, (1, 0, 2))
    out = quaternion_soft_attention_pooling(x_nm, batch, num_graphs, wq, bq, wrt, brt)
    out = jax.block_until_ready(out)
    ref = _reference(x4, batch, num_graphs, wq, bq, wrt, brt)
    assert out.shape == (4, num_graphs, embed_dim)
    assert jnp.allclose(out, ref, atol=1e-4, rtol=1e-4), "mismatch vs reference (test 1)"

    # ------ test 2: multi-tile + ragged tail + uneven parallel-chunk path ------
    n2, b2 = 300, 3
    x4_2 = jax.random.normal(k2x, (4, n2, embed_dim), dtype=jnp.float32)
    batch2 = jax.random.randint(k2b, (n2,), 0, b2, dtype=jnp.int32)
    out2 = quaternion_soft_attention_pooling(
        jnp.transpose(x4_2, (1, 0, 2)), batch2, b2, wq, bq, wrt, brt,
        tile_n=128, parallel_chunks=2)   # n_tiles=3, chunks=2 -> one over-run tile skipped
    out2 = jax.block_until_ready(out2)
    ref2 = _reference(x4_2, batch2, b2, wq, bq, wrt, brt)
    assert jnp.allclose(out2, ref2, atol=1e-4, rtol=1e-4), "mismatch vs reference (test 2)"

    # ------ test 3: default (auto parallel_chunks, big tile_n clamp) path ------
    out3 = quaternion_soft_attention_pooling(
        jnp.transpose(x4_2, (1, 0, 2)), batch2, b2, wq, bq, wrt, brt)
    out3 = jax.block_until_ready(out3)
    assert jnp.allclose(out3, ref2, atol=1e-4, rtol=1e-4), "mismatch vs reference (test 3)"

    print("KERNEL_OK")
</pallas_src>

<mosaic_0001>
module attributes {stable_mosaic.version = 11 : i64} {
  func.func @_qsoftattn_pool_kernel(%arg0: i32, %arg1: i32, %arg2: memref<128x128xf32, #tpu.memory_space<vmem>>, %arg3: memref<1x128xi32, #tpu.memory_space<vmem>>, %arg4: memref<128x128xf32, #tpu.memory_space<vmem>>, %arg5: memref<1x128xf32, #tpu.memory_space<vmem>>, %arg6: memref<1x2x128xf32, #tpu.memory_space<vmem>>, %arg7: memref<2x128xf32, #tpu.memory_space<vmem>>) attributes {dimension_semantics = [#tpu.dimension_semantics<parallel>, #tpu.dimension_semantics<arbitrary>], iteration_bounds = array<i64: 1, 1>, scalar_prefetch = 0 : i64, scratch_operands = 1 : i64, tpu.core_type = #tpu.core_type<tc>, window_params = [{transform_indices = @transform_0, window_bounds = array<i64: 128, 128>}, {transform_indices = @transform_1, window_bounds = array<i64: 1, 128>}, {pipeline_mode = #tpu.pipeline_mode<synchronous>, transform_indices = @transform_2, window_bounds = array<i64: 128, 128>}, {pipeline_mode = #tpu.pipeline_mode<synchronous>, transform_indices = @transform_3, window_bounds = array<i64: 1, 128>}, {transform_indices = @transform_4, window_bounds = array<i64: 1, 2, 128>}]} {
    %c1_i32 = arith.constant 1 : i32
    %0 = arith.muli %arg0, %c1_i32 : i32
    %1 = arith.addi %0, %arg1 : i32
    %c0_i32 = arith.constant 0 : i32
    %2 = arith.cmpi eq, %arg1, %c0_i32 : i32
    %3 = arith.extui %2 : i1 to i32
    %c0_i32_0 = arith.constant 0 : i32
    %4 = arith.cmpi ne, %3, %c0_i32_0 : i32
    scf.if %4 {
      %cst = arith.constant 0.000000e+00 : f32
      %11 = vector.broadcast %cst : f32 to vector<2x128xf32>
      %c0 = arith.constant 0 : index
      %c0_5 = arith.constant 0 : index
      %12 = vector.load %arg7[%c0, %c0_5] : memref<2x128xf32, #tpu.memory_space<vmem>>, vector<2x128xf32>
      tpu.vector_store %arg7[%c0, %c0_5], %11 {strides = array<i32>} : memref<2x128xf32, #tpu.memory_space<vmem>>, vector<2x128xf32>,
    } else {
    }
    %c1_i32_1 = arith.constant 1 : i32
    %5 = arith.cmpi slt, %1, %c1_i32_1 : i32
    %6 = arith.extui %5 : i1 to i32
    %c0_i32_2 = arith.constant 0 : i32
    %7 = arith.cmpi ne, %6, %c0_i32_2 : i32
    scf.if %7 {
      %c0 = arith.constant 0 : index
      %c0_5 = arith.constant 0 : index
      %11 = vector.load %arg2[%c0, %c0_5] : memref<128x128xf32, #tpu.memory_space<vmem>>, vector<128x128xf32>
      %c0_6 = arith.constant 0 : index
      %c0_7 = arith.constant 0 : index
      %12 = vector.load %arg4[%c0_6, %c0_7] : memref<128x128xf32, #tpu.memory_space<vmem>>, vector<128x128xf32>
      %cst = arith.constant dense<0.000000e+00> : vector<128x128xf32>
      %13 = tpu.matmul %11, %12, %cst {dimension_numbers = #tpu.dot_dimension_numbers<[1], [0], [0], [1], [0, 0, 1, 1], [], []>} : vector<128x128xf32>, vector<128x128xf32>, vector<128x128xf32> -> vector<128x128xf32>
      %c0_8 = arith.constant 0 : index
      %c0_9 = arith.constant 0 : index
      %14 = vector.load %arg5[%c0_8, %c0_9] : memref<1x128xf32, #tpu.memory_space<vmem>>, vector<1x128xf32>
      %15 = vector.broadcast %14 : vector<1x128xf32> to vector<128x128xf32>
      %16 = arith.addf %13, %15 : vector<128x128xf32>
      %17 = arith.negf %16 : vector<128x128xf32>
      %18 = math.exp %17 : vector<128x128xf32>
      %cst_10 = arith.constant 1.000000e+00 : f32
      %19 = vector.broadcast %cst_10 : f32 to vector<128x128xf32>
      %20 = arith.addf %19, %18 : vector<128x128xf32>
      %21 = arith.divf %19, %20 : vector<128x128xf32>
      %22 = arith.mulf %11, %21 : vector<128x128xf32>
      %c128_i32 = arith.constant 128 : i32
      %23 = arith.muli %1, %c128_i32 : i32
      %24 = tpu.iota {dimensions = array<i32: 0>} : vector<128x1xi32>
      %25 = vector.broadcast %23 : i32 to vector<128x1xi32>
      %26 = arith.addi %25, %24 : vector<128x1xi32>
      %c8_i32 = arith.constant 8 : i32
      %27 = vector.broadcast %c8_i32 : i32 to vector<128x1xi32>
      %28 = arith.cmpi slt, %26, %27 : vector<128x1xi32>
      %cst_11 = arith.constant 0.000000e+00 : f32
      %29 = vector.shape_cast %28 : vector<128x1xi1> to vector<128x1xi1>
      %30 = vector.broadcast %29 : vector<128x1xi1> to vector<128x128xi1>
      %31 = vector.broadcast %cst_11 : f32 to vector<128x128xf32>
      %32 = arith.select %30, %22, %31 : vector<128x128xi1>, vector<128x128xf32>
      %33 = tpu.iota {dimensions = array<i32: 0>} : vector<2x128xi32>
      %c0_12 = arith.constant 0 : index
      %c0_13 = arith.constant 0 : index
      %34 = vector.load %arg3[%c0_12, %c0_13] : memref<1x128xi32, #tpu.memory_space<vmem>>, vector<1x128xi32>
      %35 = vector.broadcast %34 : vector<1x128xi32> to vector<2x128xi32>
      %36 = arith.cmpi eq, %33, %35 : vector<2x128xi32>
      %37 = arith.extui %36 : vector<2x128xi1> to vector<2x128xi32>
      %38 = arith.sitofp %37 : vector<2x128xi32> to vector<2x128xf32>
      %c0_14 = arith.constant 0 : index
      %c0_15 = arith.constant 0 : index
      %39 = vector.load %arg7[%c0_14, %c0_15] : memref<2x128xf32, #tpu.memory_space<vmem>>, vector<2x128xf32>
      %cst_16 = arith.constant dense<0.000000e+00> : vector<2x128xf32>
      %40 = tpu.matmul %38, %32, %cst_16 {dimension_numbers = #tpu.dot_dimension_numbers<[1], [0], [0], [1], [0, 0, 1, 1], [], []>} : vector<2x128xf32>, vector<128x128xf32>, vector<2x128xf32> -> vector<2x128xf32>
      %41 = arith.addf %39, %40 : vector<2x128xf32>
      %c0_17 = arith.constant 0 : index
      %c0_18 = arith.constant 0 : index
      %42 = vector.load %arg7[%c0_17, %c0_18] : memref<2x128xf32, #tpu.memory_space<vmem>>, vector<2x128xf32>
      tpu.vector_store %arg7[%c0_17, %c0_18], %41 {strides = array<i32>} : memref<2x128xf32, #tpu.memory_space<vmem>>, vector<2x128xf32>,
    } else {
    }
    %c0_i32_3 = arith.constant 0 : i32
    %8 = arith.cmpi eq, %arg1, %c0_i32_3 : i32
    %9 = arith.extui %8 : i1 to i32
    %c0_i32_4 = arith.constant 0 : i32
    %10 = arith.cmpi ne, %9, %c0_i32_4 : i32
    scf.if %10 {
      %c0 = arith.constant 0 : index
      %c0_5 = arith.constant 0 : index
      %11 = vector.load %arg7[%c0, %c0_5] : memref<2x128xf32, #tpu.memory_space<vmem>>, vector<2x128xf32>
      %c0_6 = arith.constant 0 : index
      %c0_7 = arith.constant 0 : index
      %c0_8 = arith.constant 0 : index
      %12 = vector.load %arg6[%c0_6, %c0_7, %c0_8] : memref<1x2x128xf32, #tpu.memory_space<vmem>>, vector<1x2x128xf32>
      %13 = vector.shape_cast %12 : vector<1x2x128xf32> to vector<2x128xf32>
      %14 = vector.shape_cast %11 : vector<2x128xf32> to vector<1x2x128xf32>
      tpu.vector_store %arg6[%c0_6, %c0_7, %c0_8], %14 {strides = array<i32>} : memref<1x2x128xf32, #tpu.memory_space<vmem>>, vector<1x2x128xf32>,
    } else {
    }
    return
  }
  func.func @transform_0(%arg0: i32, %arg1: i32) -> (i32, i32) {
    %c1_i32 = arith.constant 1 : i32
    %0 = arith.muli %arg0, %c1_i32 : i32
    %1 = arith.addi %0, %arg1 : i32
    %c0_i32 = arith.constant 0 : i32
    %2 = arith.minsi %1, %c0_i32 : i32
    %c0_i32_0 = arith.constant 0 : i32
    %c0_i32_1 = arith.constant 0 : i32
    return %2, %c0_i32_0 : i32, i32
  }
  func.func @transform_1(%arg0: i32, %arg1: i32) -> (i32, i32) {
    %c1_i32 = arith.constant 1 : i32
    %0 = arith.muli %arg0, %c1_i32 : i32
    %1 = arith.addi %0, %arg1 : i32
    %c0_i32 = arith.constant 0 : i32
    %2 = arith.minsi %1, %c0_i32 : i32
    %c0_i32_0 = arith.constant 0 : i32
    %c0_i32_1 = arith.constant 0 : i32
    return %c0_i32_0, %2 : i32, i32
  }
  func.func @transform_2(%arg0: i32, %arg1: i32) -> (i32, i32) {
    %c0_i32 = arith.constant 0 : i32
    %c0_i32_0 = arith.constant 0 : i32
    %c0_i32_1 = arith.constant 0 : i32
    return %c0_i32, %c0_i32_0 : i32, i32
  }
  func.func @transform_3(%arg0: i32, %arg1: i32) -> (i32, i32) {
    %c0_i32 = arith.constant 0 : i32
    %c0_i32_0 = arith.constant 0 : i32
    %c0_i32_1 = arith.constant 0 : i32
    return %c0_i32, %c0_i32_0 : i32, i32
  }
  func.func @transform_4(%arg0: i32, %arg1: i32) -> (i32, i32, i32) {
    %c0_i32 = arith.constant 0 : i32
    %c0_i32_0 = arith.constant 0 : i32
    %c0_i32_1 = arith.constant 0 : i32
    return %arg0, %c0_i32, %c0_i32_0 : i32, i32, i32
  }
}

</mosaic_0001>

<bundles_post_ra>
// kernel: tpu_custom_call.1
= control target key start
LH: loop header
LB: loop body
LE: loop exit
PB: predicated region body
PF: predicated region fallthrough
CT: control target
= control target key end

     0   :  { %9 = vsyncpa [#allocation4], 0  ;;  %s924_s0 = inlined_call_operand.hbm [shape: f32[8,128], index: 0, kind: input, shape index: {}]   ;;  %s925_s1 = inlined_call_operand.vmem [shape: s32[1,8], index: 1, kind: input, shape index: {}]   ;;  %s926_s2 = inlined_call_operand.hbm [shape: f32[128,128], index: 2, kind: input, shape index: {}]   ;;  %s927_s3 = inlined_call_operand.vmem [shape: f32[1,128], index: 3, kind: input, shape index: {}]   ;;  %s928_s4 = inlined_call_operand.hbm [shape: f32[1,2,128], index: 4, kind: output, shape index: {}]  }
   0x1   :  { %10 = vsyncpa [#allocation7], 0 }
   0x2   :  { %11 = vsyncpa [#allocation5], 0 }
   0x3   :  { %22 = vsyncadd [#allocation4], 1920  ;;  %s845_s15 = smov [#allocation3]   ;;  %s773_s19 = scalar_lea.hbm %s924_s0, 128 }
   0x4   :  { %s27_s16 = sshll.u32 %s845_s15, 4  ;;  %p774_p0 = scmp.ne.s32.totalorder %s924_s0, %s773_s19  ;;  %s28_s16 = int_to_ptr.vmem [resolvable:$true] %s27_s16 }
   0x5   :  { %p777_p1 = scmp.lt.u32.totalorder %s773_s19, %s924_s0 }
   0x7   :  { %p779_p2 = pnand %p777_p1, %p774_p0 }
   0x9   :  { %782 = shalt.err (!%p779_p2)
}
   0xa   :  { %s783_s24 = scalar_lea.vmem %s28_s16, 128  ;;  %s787_s25 = scalar_lea.vmem %s28_s16, 2048 }
   0xb   :  { %p784_p3 = scmp.ne.s32.totalorder %s28_s16, %s783_s24  ;;  %p788_p4 = scmp.lt.s32.totalorder %s28_s16, %s28_s16 }
   0xc   :  { %p789_p5 = scmp.lt.s32.totalorder %s787_s25, %s783_s24 }
   0xe   :  { %p790_p6 = por %p789_p5, %p788_p4 }
  0x10   :  { %p791_p7 = pnand %p790_p6, %p784_p3 }
  0x12   :  { %794 = shalt.err (!%p791_p7)
}
  0x13   :  { %s846_s26 = smov 128   ;;  %s847_s27 = smov 8  }
  0x14   :  { %33 = dma.hbm_to_vmem [thread:$0]  %s924_s0, 128, %s28_s16, [#allocation4], %s846_s26, %s846_s26, %s847_s27  }
  0x15   :  { %s848_s30 = smov [#allocation6]   ;;  %s795_s8 = scalar_lea.hbm %s926_s2, 2048 }
  0x16   :  { %s50_s5 = sshll.u32 %s848_s30, 4  ;;  %p796_p8 = scmp.ne.s32.totalorder %s926_s2, %s795_s8  ;;  %s51_s5 = int_to_ptr.vmem [resolvable:$true] %s50_s5 }
  0x17   :  { %p799_p9 = scmp.lt.u32.totalorder %s795_s8, %s926_s2 }
  0x19   :  { %p801_p10 = pnand %p799_p9, %p796_p8 }
  0x1b   :  { %804 = shalt.err (!%p801_p10)
}
  0x1c   :  { %s805_s13 = scalar_lea.vmem %s51_s5, 2048  ;;  %p810_p12 = scmp.lt.s32.totalorder %s51_s5, %s51_s5 }
  0x1d   :  { %p806_p11 = scmp.ne.s32.totalorder %s51_s5, %s805_s13  ;;  %p811_p13 = scmp.lt.s32.totalorder %s805_s13, %s805_s13 }
  0x1f   :  { %p812_p0 = por %p811_p13, %p810_p12 }
  0x21   :  { %p813_p1 = pnand %p812_p0, %p806_p11 }
  0x23   :  { %816 = shalt.err (!%p813_p1)
}
  0x24   :  { %56 = dma.hbm_to_vmem [thread:$0]  %s926_s2, 2048, %s51_s5, [#allocation7], %s846_s26, %s846_s26, %s847_s27  }
  0x25   :  { %839 = dma.done.wait [#allocation4], 2048  }
  0x26   :  { %840 = vsyncadd [#allocation4], 4294965248 }
  0x27   :  { %841 = dma.done.wait [#allocation7], 2048  }
  0x28   :  { %842 = vsyncadd [#allocation7], 4294965248  ;;  %v112_v0 = vld [vmem:[#allocation6] sm:$0xff]  ;;  %v113_v1 = vld [vmem:[#allocation6 + $0x8] sm:$0xff]  ;;  %v849_v28 = vmov 0.0   ;;  %vm850_vm0 = vmmov 0   ;;  %v393_v48 = vlaneseq }
  0x29   :  { %v114_v2 = vld [vmem:[#allocation6 + $0x10] sm:$0xff]  ;;  %v713_v3 = vpack.c.bf16 %v113_v1, %v112_v0  ;;  %v115_v4 = vld [vmem:[#allocation6 + $0x18] sm:$0xff]  ;;  %v116_v6 = vld [vmem:[#allocation6 + $0x20] sm:$0xff]  ;;  %91 = vst [vmem:[#allocation2] sm:$0x3] %v849_v28  ;;  %v851_v53 = vmov 1.0  }
  0x2a   :  { %v717_v5 = vpack.c.bf16 %v115_v4, %v114_v2  ;;  %v117_v7 = vld [vmem:[#allocation6 + $0x28] sm:$0xff]  ;;  %v902_v9 = vld [vmem:[#allocation3] sm:$0xff]  ;;  %v118_v10 = vld [vmem:[#allocation6 + $0x30] sm:$0xff]  ;;  %v394_v49 = vshrl.u32 %v393_v48, 7 }
  0x2b   :  { %714 = vmatprep.subr.bf16.mxu0 %v713_v3  ;;  %745 = vmatprep.subr.bf16.mxu1 %v713_v3  ;;  %v721_v8 = vpack.c.bf16 %v117_v7, %v116_v6  ;;  %v119_v11 = vld [vmem:[#allocation6 + $0x38] sm:$0xff]  ;;  %v120_v13 = vld [vmem:[#allocation6 + $0x40] sm:$0xff]  ;;  %v121_v14 = vld [vmem:[#allocation6 + $0x48] sm:$0xff] }
  0x2c   :  { %716 = vmatpush3.bf16.msra.mxu0 %v713_v3  ;;  %753 = vmatpush3.bf16.msra.mxu1 %v713_v3  ;;  %v725_v12 = vpack.c.bf16 %v119_v11, %v118_v10  ;;  %v729_v15 = vpack.c.bf16 %v121_v14, %v120_v13  ;;  %v122_v16 = vld [vmem:[#allocation6 + $0x50] sm:$0xff]  ;;  %v123_v17 = vld [vmem:[#allocation6 + $0x58] sm:$0xff]  ;;  %v124_v19 = vld [vmem:[#allocation6 + $0x60] sm:$0xff] }
  0x2d   :  { %718 = vmatprep.subr.bf16.mxu0 %v717_v5  ;;  %746 = vmatprep.subr.bf16.mxu1 %v717_v5  ;;  %v733_v18 = vpack.c.bf16 %v123_v17, %v122_v16  ;;  %v125_v20 = vld [vmem:[#allocation6 + $0x68] sm:$0xff]  ;;  %v126_v22 = vld [vmem:[#allocation6 + $0x70] sm:$0xff]  ;;  %v127_v23 = vld [vmem:[#allocation6 + $0x78] sm:$0xff] }
  0x2e   :  { %684 = vmatprep.mubr.f32.mxu0 %v902_v9  ;;  %v737_v21 = vpack.c.bf16 %v125_v20, %v124_v19  ;;  %v741_v24 = vpack.c.bf16 %v127_v23, %v126_v22  ;;  %v97_v25 = vld [vmem:[#allocation3 + $0x8] sm:$0xff]  ;;  %v106_v26 = vld [vmem:[#allocation3 + $0x50] sm:$0xff]  ;;  %v107_v27 = vld [vmem:[#allocation3 + $0x58] sm:$0xff] }
  0x2f   :  { %699 = vmatprep.mubr.f32.mxu1 %v106_v26  ;;  %v108_v29 = vld [vmem:[#allocation3 + $0x60] sm:$0xff]  ;;  %v109_v30 = vld [vmem:[#allocation3 + $0x68] sm:$0xff]  ;;  %v110_v31 = vld [vmem:[#allocation3 + $0x70] sm:$0xff] }
  0x30   :  { %720 = vmatpush3.bf16.msra.mxu0 %v717_v5  ;;  %754 = vmatpush3.bf16.msra.mxu1 %v717_v5  ;;  %v111_v32 = vld [vmem:[#allocation3 + $0x78] sm:$0xff]  ;;  %v98_v33 = vld [vmem:[#allocation3 + $0x10] sm:$0xff]  ;;  %v100_v35 = vld [vmem:[#allocation3 + $0x20] sm:$0xff] }
  0x31   :  { %722 = vmatprep.subr.bf16.mxu0 %v721_v8  ;;  %747 = vmatprep.subr.bf16.mxu1 %v721_v8  ;;  %v99_v34 = vld [vmem:[#allocation3 + $0x18] sm:$0xff]  ;;  %v101_v36 = vld [vmem:[#allocation3 + $0x28] sm:$0xff]  ;;  %v102_v37 = vld [vmem:[#allocation3 + $0x30] sm:$0xff] }
  0x32   :  { %v103_v38 = vld [vmem:[#allocation3 + $0x38] sm:$0xff]  ;;  %v104_v39 = vld [vmem:[#allocation3 + $0x40] sm:$0xff]  ;;  %v105_v40 = vld [vmem:[#allocation3 + $0x48] sm:$0xff] }
  0x33   :  { %v598_v41 = vld [vmem:[%s927_s3] ss:$0 sm:$0xff] }
  0x34   :  { %724 = vmatpush3.bf16.msra.mxu0 %v721_v8  ;;  %755 = vmatpush3.bf16.msra.mxu1 %v721_v8  ;;  %v615_v50 = vld [vmem:[%s925_s1] ss:$0 sm:$0xff]  ;;  %s852_s1 = smov [#allocation8]  }
  0x35   :  { %726 = vmatprep.subr.bf16.mxu0 %v725_v12  ;;  %748 = vmatprep.subr.bf16.mxu1 %v725_v12  ;;  %vm496_vm1 = vcmp.eq.s32.totalorder %v394_v49, %v615_v50  ;;  %v499_v4 = vld [vmem:[#allocation2] sm:$0x3]  ;;  %s583_s3 = sshll.u32 %s852_s1, 4  ;;  %s584_s3 = int_to_ptr.vmem [resolvable:$true] %s583_s3 }
  0x36   :  { %s817_s18 = scalar_lea.vmem %s584_s3, 32  ;;  %p822_p3 = scmp.lt.s32.totalorder %s584_s3, %s584_s3 }
  0x37   :  { %p818_p2 = scmp.ne.s32.totalorder %s584_s3, %s817_s18  ;;  %p823_p4 = scmp.lt.s32.totalorder %s817_s18, %s817_s18 }
  0x38   :  { %728 = vmatpush3.bf16.msra.mxu0 %v725_v12  ;;  %756 = vmatpush3.bf16.msra.mxu1 %v725_v12 }
  0x39   :  { %730 = vmatprep.subr.bf16.mxu0 %v729_v15  ;;  %749 = vmatprep.subr.bf16.mxu1 %v729_v15  ;;  %p824_p5 = por %p823_p4, %p822_p3 }
  0x3b   :  { %p825_p6 = pnand %p824_p5, %p818_p2 }
  0x3c   :  { %732 = vmatpush3.bf16.msra.mxu0 %v729_v15  ;;  %757 = vmatpush3.bf16.msra.mxu1 %v729_v15 }
  0x3d   :  { %734 = vmatprep.subr.bf16.mxu0 %v733_v18  ;;  %750 = vmatprep.subr.bf16.mxu1 %v733_v18 }
  0x40   :  { %736 = vmatpush3.bf16.msra.mxu0 %v733_v18  ;;  %758 = vmatpush3.bf16.msra.mxu1 %v733_v18 }
  0x41   :  { %738 = vmatprep.subr.bf16.mxu0 %v737_v21  ;;  %751 = vmatprep.subr.bf16.mxu1 %v737_v21 }
  0x44   :  { %740 = vmatpush3.bf16.msra.mxu0 %v737_v21  ;;  %759 = vmatpush3.bf16.msra.mxu1 %v737_v21 }
  0x45   :  { %742 = vmatprep.subr.bf16.mxu0 %v741_v24  ;;  %752 = vmatprep.subr.bf16.mxu1 %v741_v24 }
  0x48   :  { %744 = vmatpush3.bf16.msra.mxu0 %v741_v24  ;;  %760 = vmatpush3.bf16.msra.mxu1 %v741_v24 }
  0x49   :  { %708 = vmatprep.subr.mxu1 %v849_v28 }
  0x4b   :  { %685 = vmatmul.mubr.f32.vlgmr.msra.gmra.mrb[0].mxu0 %v97_v25  ;;  %700 = vmatmul.mubr.f32.vlgmr.msra.gmra.mrb[0].mxu1 %v107_v27 }
  0x4c   :  { %702 = vmatprep.mubr.f32.mxu1 %v108_v29  ;;  %687 = vmatprep.mubr.f32.mxu0 %v98_v33 }
  0x4f   :  { %703 = vmatmul.mubr.f32.gmra.mrb[2].mxu1 %v109_v30  ;;  %688 = vmatmul.mubr.f32.gmra.mrb[2].mxu0 %v99_v34 }
  0x50   :  { %705 = vmatprep.mubr.f32.mxu1 %v110_v31  ;;  %690 = vmatprep.mubr.f32.mxu0 %v100_v35 }
  0x53   :  { %706 = vmatmul.mubr.f32.gmra.mrb[4].mxu1 %v111_v32  ;;  %691 = vmatmul.mubr.f32.gmra.mrb[4].mxu0 %v101_v36 }
  0x54   :  { %710 = vmatprep.mubr.msk.f32.mxu1 %vm850_vm0, %v849_v28  ;;  %693 = vmatprep.mubr.f32.mxu0 %v102_v37 }
  0x57   :  { %694 = vmatmul.mubr.f32.gmra.mrb[6].mxu0 %v103_v38 }
  0x58   :  { %696 = vmatprep.mubr.f32.mxu0 %v104_v39 }
  0x5b   :  { %697 = vmatmul.mubr.f32.gmra.mrb[8].mxu0 %v105_v40 }
 0x11e   :  { %v686_v42 = vpop.f32.mrb[0].mxu0  ;;  %v701_v54 = vpop.f32.mrb[0].mxu1 }
 0x11f   :  { %v201_v43 = vpop.f32.mrb[1].mxu0  ;;  %v251_v55 = vpop.f32.mrb[1].mxu1 }
 0x120   :  { %v202_v44 = vadd.f32 %v598_v41, %v201_v43 }
 0x122   :  { %v599_v45 = vmul.f32 -1.442695, %v202_v44  ;;  %v704_v56 = vpop.f32.mrb[2].mxu1  ;;  %v689_v60 = vpop.f32.mrb[2].mxu0 }
 0x123   :  { %v261_v57 = vpop.f32.mrb[3].mxu1  ;;  %v211_v61 = vpop.f32.mrb[3].mxu0 }
 0x124   :  { %769 = vpow2.f32 %v599_v45 }
 0x126   :  { %v707_v58 = vpop.f32.mrb[4].mxu1  ;;  %v692_v62 = vpop.f32.mrb[4].mxu0 }
 0x127   :  { %v271_v59 = vpop.f32.mrb[5].mxu1  ;;  %v221_v63 = vpop.f32.mrb[5].mxu0 }
 0x12a   :  { %v695_v0 = vpop.f32.mrb[6].mxu0 }
 0x12b   :  { %v231_v1 = vpop.f32.mrb[7].mxu0 }
 0x12e   :  { %v770_v46 = vpop.eup %769  ;;  %v698_v2 = vpop.f32.mrb[8].mxu0 }
 0x12f   :  { %v328_v47 = vadd.f32 1.0, %v770_v46  ;;  %v241_v3 = vpop.f32.mrb[9].mxu0 }
 0x131   :  { %771 = vrcp.f32 %v328_v47 }
 0x13b   :  { %v772_v51 = vpop.eup %771 }
 0x13c   :  { %v376_v52 = vmul.f32 %v772_v51, %v902_v9 }
 0x13e   :  { %709 = vmatpush3.msra.mxu1 %v376_v52 }
 0x13f   :  { %711 = vmatmul.mubr.msk.f32.vlgmr.msra.gmra.mrb[6].mxu1 %vm496_vm1, %v851_v53 }
 0x212   :  { %v566_v5 = vpop.f32.mrb[6].mxu1 }
 0x213   :  { %v570_v6 = vadd.f32 %v566_v5, %v499_v4  ;;  %v712_v7 = vpop.f32.mrb[7].mxu1 }
 0x215   :  { %571 = vst [vmem:[#allocation2] sm:$0x3] %v570_v6 }
 0x21c   :  { %v575_v8 = vld [vmem:[#allocation2] sm:$0x3] }
 0x21d   :  { %576 = vst [vmem:[#allocation8] sm:$0x3] %v575_v8 }
 0x21e   :  { %828 = shalt.err (!%p825_p6)
}
 0x21f   :  { %s829_s21 = scalar_lea.hbm %s928_s4, 32 }
 0x220   :  { %p830_p7 = scmp.ne.s32.totalorder %s928_s4, %s829_s21  ;;  %p833_p8 = scmp.lt.u32.totalorder %s829_s21, %s928_s4 }
 0x222   :  { %p835_p9 = pnand %p833_p8, %p830_p7 }
 0x224   :  { %838 = shalt.err (!%p835_p9)
}
 0x225   :  { %586 = dma.vmem_to_hbm [thread:$0]  %s584_s3, 32, %s928_s4, [#allocation5]  }
 0x226   :  { %843 = dma.done.wait [#allocation5], 32  }
 0x227   :  { %844 = vsyncadd [#allocation5], 4294967264 }
 0x228   :  { %590 = vsyncpa [#allocation4], 1 }
 0x229   :  { %591 = vsyncpa [#allocation7], 1 }
 0x22a   :  { %592 = vsyncpa [#allocation5], 1 }

</bundles_post_ra>
